<compile_context>
chip_gen: v6e
topology: v6e:2x2x1
jax: 0.10.0
libtpu: 0.0.40
codegen_flags: <defaults>
</compile_context>

<pallas_src>
import jax
import jax.numpy as jnp
from jax.experimental import pallas as pl
from jax.experimental.pallas import tpu as pltpu


def _round_up(x, m):
    return ((x + m - 1) // m) * m


def _pad2d(a, rows, cols):
    r, c = a.shape
    if r == rows and c == cols:
        return a
    return jnp.pad(a, ((0, rows - r), (0, cols - c)))


def _make_kernel(has_bias):
    def kernel(x_ref, bwt_ref, awt_ref, wrest_ref, *rest):
        if has_bias:
            bias_ref, out_ref, acc_ref, t_ref = rest
        else:
            bias_ref = None
            out_ref, acc_ref, t_ref = rest

        k = pl.program_id(2)

        @pl.when(k == 0)
        def _():
            acc_ref[...] = jnp.zeros_like(acc_ref)
            t_ref[...] = jnp.zeros_like(t_ref)

        x = x_ref[...]
        # residual path partial:  (tm, tk) @ (tk, tn) -> (tm, tn)
        acc_ref[...] += jnp.dot(x, wrest_ref[...],
                                preferred_element_type=jnp.float32)
        # low-rank path partial:  (tm, tk) @ (tk, Rp) -> (tm, Rp)
        t_ref[...] += jnp.dot(x, bwt_ref[...],
                              preferred_element_type=jnp.float32)

        @pl.when(k == pl.num_programs(2) - 1)
        def _():
            # low-rank second matmul once per (i, j) tile:  (tm, Rp) @ (Rp, tn)
            y = acc_ref[...] + jnp.dot(t_ref[...].astype(awt_ref.dtype),
                                       awt_ref[...],
                                       preferred_element_type=jnp.float32)
            if has_bias:
                y = y + bias_ref[...]
            out_ref[...] = y.astype(out_ref.dtype)

    return kernel


def corda_adapter_forward(inp, b_weight, a_weight, weight_residual, bias=None,
                          *, tm=256, tn=256, tk=512, compute_dtype=None):
    """inp: [..., in_features]; returns [..., out_features].

    compute_dtype: dtype for the MXU operands (e.g. jnp.bfloat16 on v6e/v7x);
    accumulation is always f32. Defaults to the input dtype.
    """
    rank, in_features = b_weight.shape
    out_features = a_weight.shape[0]
    lead_shape = inp.shape[:-1]
    M = 1
    for d in lead_shape:
        M *= d
    if compute_dtype is None:
        compute_dtype = inp.dtype

    x2d = inp.reshape(M, in_features).astype(compute_dtype)

    # One-time wrapper-side transposes -> lane-dense layouts, no in-kernel .T.
    bw_t = b_weight.T.astype(compute_dtype)            # (K, R)
    aw_t = a_weight.T.astype(compute_dtype)            # (R, O)
    wres_t = weight_residual.T.astype(compute_dtype)   # (K, O)

    # Tile sizes: sized for v7x VMEM budget, clamped for small problems.
    tm = min(tm, _round_up(M, 8))
    tn = min(tn, _round_up(out_features, 128))
    tk = min(tk, _round_up(in_features, 128))
    Rp = _round_up(rank, 128)

    Mp = _round_up(M, tm)
    Kp = _round_up(in_features, tk)
    Op = _round_up(out_features, tn)

    x_p = _pad2d(x2d, Mp, Kp)
    bw_p = _pad2d(bw_t, Kp, Rp)
    aw_p = _pad2d(aw_t, Rp, Op)
    wres_p = _pad2d(wres_t, Kp, Op)

    has_bias = bias is not None

    in_specs = [
        pl.BlockSpec((tm, tk), lambda i, j, k: (i, k)),   # x
        pl.BlockSpec((tk, Rp), lambda i, j, k: (k, 0)),   # Bw.T
        pl.BlockSpec((Rp, tn), lambda i, j, k: (0, j)),   # Aw.T
        pl.BlockSpec((tk, tn), lambda i, j, k: (k, j)),   # Wres.T
    ]
    args = [x_p, bw_p, aw_p, wres_p]
    if has_bias:
        bias_p = _pad2d(bias.reshape(1, out_features).astype(jnp.float32), 1, Op)
        in_specs.append(pl.BlockSpec((1, tn), lambda i, j, k: (0, j)))
        args.append(bias_p)

    grid = (Mp // tm, Op // tn, Kp // tk)

    out2d = pl.pallas_call(
        _make_kernel(has_bias),
        out_shape=jax.ShapeDtypeStruct((Mp, Op), inp.dtype),
        grid=grid,
        in_specs=in_specs,
        out_specs=pl.BlockSpec((tm, tn), lambda i, j, k: (i, j)),
        scratch_shapes=[
            pltpu.VMEM((tm, tn), jnp.float32),   # residual-path accumulator
            pltpu.VMEM((tm, Rp), jnp.float32),   # low-rank intermediate
        ],
        compiler_params=pltpu.CompilerParams(
            dimension_semantics=("parallel", "parallel", "arbitrary")),
    )(*args)

    out2d = out2d[:M, :out_features]
    return out2d.reshape(*lead_shape, out_features)


def build_corda_params(key, out_features, in_features, rank, sigma_fuse="UV",
                       with_bias=True):
    """Deterministic synthetic init matching CorDA_adapter.__init__ shapes."""
    k_u, k_s, k_v, k_r, k_b = jax.random.split(key, 5)
    U = jax.random.normal(k_u, (out_features, rank), dtype=jnp.float32)
    S = jax.random.uniform(k_s, (rank,), dtype=jnp.float32, minval=0.5, maxval=2.0)
    V = jax.random.normal(k_v, (in_features, rank), dtype=jnp.float32)
    weight_residual = jax.random.normal(k_r, (out_features, in_features),
                                        dtype=jnp.float32) * 0.05
    bias = (jax.random.normal(k_b, (out_features,), dtype=jnp.float32) * 0.1
            if with_bias else None)

    if sigma_fuse == "UV":
        a_weight = U * jnp.sqrt(S)[None, :]                 # (O, R)
        b_weight = V.T * jnp.sqrt(S)[:, None]               # (R, K)
    elif sigma_fuse == "U":
        a_weight = U * S[None, :]
        b_weight = V.T
    elif sigma_fuse == "V":
        a_weight = U
        b_weight = V.T * S[:, None]
    else:
        raise ValueError(sigma_fuse)
    return a_weight, b_weight, weight_residual, bias


def _reference(inp, b_w, a_w, w_res, bias):
    ref = (inp @ b_w.T) @ a_w.T + inp @ w_res.T
    if bias is not None:
        ref = ref + bias[None, None, :]
    return ref


if __name__ == "__main__":
    key = jax.random.PRNGKey(0)

    # --- test 1: small module-like shapes, with bias -------------------------
    batch, seq = 2, 8
    in_features, out_features, rank = 32, 32, 8
    k_params, k_inp, k2 = jax.random.split(key, 3)
    a_w, b_w, w_res, bias = build_corda_params(
        k_params, out_features, in_features, rank, sigma_fuse="UV", with_bias=True)
    inp = jax.random.normal(k_inp, (batch, seq, in_features), dtype=jnp.float32)

    out = corda_adapter_forward(inp, b_w, a_w, w_res, bias)
    out = jax.block_until_ready(out)
    ref = _reference(inp, b_w, a_w, w_res, bias)
    assert out.shape == (batch, seq, out_features)
    assert jnp.allclose(out, ref, atol=1e-3, rtol=1e-3)

    # --- test 2: exercises multi-tile grid, padding and the no-bias path -----
    batch2, seq2 = 2, 136                      # M = 272 -> padded to 384 (tm=128)
    in2, out2, rank2 = 384, 256, 16
    kp2, ki2 = jax.random.split(k2)
    a_w2, b_w2, w_res2, _ = build_corda_params(
        kp2, out2, in2, rank2, sigma_fuse="UV", with_bias=False)
    inp2 = jax.random.normal(ki2, (batch2, seq2, in2), dtype=jnp.float32)

    out_b = corda_adapter_forward(inp2, b_w2, a_w2, w_res2, None,
                                  tm=128, tn=128, tk=128)
    out_b = jax.block_until_ready(out_b)
    ref_b = _reference(inp2, b_w2, a_w2, w_res2, None)
    assert out_b.shape == (batch2, seq2, out2)
    assert jnp.allclose(out_b, ref_b, atol=1e-2, rtol=1e-3)

    print("KERNEL_OK")
</pallas_src>

<mosaic_0001>
module attributes {stable_mosaic.version = 11 : i64} {
  func.func @kernel(%arg0: i32, %arg1: i32, %arg2: i32, %arg3: memref<16x128xf32, #tpu.memory_space<vmem>>, %arg4: memref<128x128xf32, #tpu.memory_space<vmem>>, %arg5: memref<128x128xf32, #tpu.memory_space<vmem>>, %arg6: memref<128x128xf32, #tpu.memory_space<vmem>>, %arg7: memref<1x128xf32, #tpu.memory_space<vmem>>, %arg8: memref<16x128xf32, #tpu.memory_space<vmem>>, %arg9: memref<16x128xf32, #tpu.memory_space<vmem>>, %arg10: memref<16x128xf32, #tpu.memory_space<vmem>>) attributes {dimension_semantics = [#tpu.dimension_semantics<parallel>, #tpu.dimension_semantics<parallel>, #tpu.dimension_semantics<arbitrary>], iteration_bounds = array<i64: 1, 1, 1>, scalar_prefetch = 0 : i64, scratch_operands = 2 : i64, tpu.core_type = #tpu.core_type<tc>, window_params = [{transform_indices = @transform_0, window_bounds = array<i64: 16, 128>}, {transform_indices = @transform_1, window_bounds = array<i64: 128, 128>}, {transform_indices = @transform_2, window_bounds = array<i64: 128, 128>}, {transform_indices = @transform_3, window_bounds = array<i64: 128, 128>}, {transform_indices = @transform_4, window_bounds = array<i64: 1, 128>}, {transform_indices = @transform_5, window_bounds = array<i64: 16, 128>}]} {
    %c0_i32 = arith.constant 0 : i32
    %0 = arith.cmpi eq, %arg2, %c0_i32 : i32
    %1 = arith.extui %0 : i1 to i32
    %c0_i32_0 = arith.constant 0 : i32
    %2 = arith.cmpi ne, %1, %c0_i32_0 : i32
    scf.if %2 {
      %cst_17 = arith.constant 0.000000e+00 : f32
      %17 = vector.broadcast %cst_17 : f32 to vector<16x128xf32>
      %c0_18 = arith.constant 0 : index
      %c0_19 = arith.constant 0 : index
      %18 = vector.load %arg9[%c0_18, %c0_19] : memref<16x128xf32, #tpu.memory_space<vmem>>, vector<16x128xf32>
      tpu.vector_store %arg9[%c0_18, %c0_19], %17 {strides = array<i32>} : memref<16x128xf32, #tpu.memory_space<vmem>>, vector<16x128xf32>,
      %cst_20 = arith.constant 0.000000e+00 : f32
      %19 = vector.broadcast %cst_20 : f32 to vector<16x128xf32>
      %c0_21 = arith.constant 0 : index
      %c0_22 = arith.constant 0 : index
      %20 = vector.load %arg10[%c0_21, %c0_22] : memref<16x128xf32, #tpu.memory_space<vmem>>, vector<16x128xf32>
      tpu.vector_store %arg10[%c0_21, %c0_22], %19 {strides = array<i32>} : memref<16x128xf32, #tpu.memory_space<vmem>>, vector<16x128xf32>,
    } else {
    }
    %c0 = arith.constant 0 : index
    %c0_1 = arith.constant 0 : index
    %3 = vector.load %arg3[%c0, %c0_1] : memref<16x128xf32, #tpu.memory_space<vmem>>, vector<16x128xf32>
    %c0_2 = arith.constant 0 : index
    %c0_3 = arith.constant 0 : index
    %4 = vector.load %arg9[%c0_2, %c0_3] : memref<16x128xf32, #tpu.memory_space<vmem>>, vector<16x128xf32>
    %c0_4 = arith.constant 0 : index
    %c0_5 = arith.constant 0 : index
    %5 = vector.load %arg6[%c0_4, %c0_5] : memref<128x128xf32, #tpu.memory_space<vmem>>, vector<128x128xf32>
    %cst = arith.constant dense<0.000000e+00> : vector<16x128xf32>
    %6 = tpu.matmul %3, %5, %cst {dimension_numbers = #tpu.dot_dimension_numbers<[1], [0], [0], [1], [0, 0, 1, 1], [], []>} : vector<16x128xf32>, vector<128x128xf32>, vector<16x128xf32> -> vector<16x128xf32>
    %7 = arith.addf %4, %6 : vector<16x128xf32>
    %c0_6 = arith.constant 0 : index
    %c0_7 = arith.constant 0 : index
    %8 = vector.load %arg9[%c0_6, %c0_7] : memref<16x128xf32, #tpu.memory_space<vmem>>, vector<16x128xf32>
    tpu.vector_store %arg9[%c0_6, %c0_7], %7 {strides = array<i32>} : memref<16x128xf32, #tpu.memory_space<vmem>>, vector<16x128xf32>,
    %c0_8 = arith.constant 0 : index
    %c0_9 = arith.constant 0 : index
    %9 = vector.load %arg10[%c0_8, %c0_9] : memref<16x128xf32, #tpu.memory_space<vmem>>, vector<16x128xf32>
    %c0_10 = arith.constant 0 : index
    %c0_11 = arith.constant 0 : index
    %10 = vector.load %arg4[%c0_10, %c0_11] : memref<128x128xf32, #tpu.memory_space<vmem>>, vector<128x128xf32>
    %cst_12 = arith.constant dense<0.000000e+00> : vector<16x128xf32>
    %11 = tpu.matmul %3, %10, %cst_12 {dimension_numbers = #tpu.dot_dimension_numbers<[1], [0], [0], [1], [0, 0, 1, 1], [], []>} : vector<16x128xf32>, vector<128x128xf32>, vector<16x128xf32> -> vector<16x128xf32>
    %12 = arith.addf %9, %11 : vector<16x128xf32>
    %c0_13 = arith.constant 0 : index
    %c0_14 = arith.constant 0 : index
    %13 = vector.load %arg10[%c0_13, %c0_14] : memref<16x128xf32, #tpu.memory_space<vmem>>, vector<16x128xf32>
    tpu.vector_store %arg10[%c0_13, %c0_14], %12 {strides = array<i32>} : memref<16x128xf32, #tpu.memory_space<vmem>>, vector<16x128xf32>,
    %c0_i32_15 = arith.constant 0 : i32
    %14 = arith.cmpi eq, %arg2, %c0_i32_15 : i32
    %15 = arith.extui %14 : i1 to i32
    %c0_i32_16 = arith.constant 0 : i32
    %16 = arith.cmpi ne, %15, %c0_i32_16 : i32
    scf.if %16 {
      %c0_17 = arith.constant 0 : index
      %c0_18 = arith.constant 0 : index
      %17 = vector.load %arg9[%c0_17, %c0_18] : memref<16x128xf32, #tpu.memory_space<vmem>>, vector<16x128xf32>
      %c0_19 = arith.constant 0 : index
      %c0_20 = arith.constant 0 : index
      %18 = vector.load %arg10[%c0_19, %c0_20] : memref<16x128xf32, #tpu.memory_space<vmem>>, vector<16x128xf32>
      %c0_21 = arith.constant 0 : index
      %c0_22 = arith.constant 0 : index
      %19 = vector.load %arg5[%c0_21, %c0_22] : memref<128x128xf32, #tpu.memory_space<vmem>>, vector<128x128xf32>
      %cst_23 = arith.constant dense<0.000000e+00> : vector<16x128xf32>
      %20 = tpu.matmul %18, %19, %cst_23 {dimension_numbers = #tpu.dot_dimension_numbers<[1], [0], [0], [1], [0, 0, 1, 1], [], []>} : vector<16x128xf32>, vector<128x128xf32>, vector<16x128xf32> -> vector<16x128xf32>
      %21 = arith.addf %17, %20 : vector<16x128xf32>
      %c0_24 = arith.constant 0 : index
      %c0_25 = arith.constant 0 : index
      %22 = vector.load %arg7[%c0_24, %c0_25] : memref<1x128xf32, #tpu.memory_space<vmem>>, vector<1x128xf32>
      %23 = vector.broadcast %22 : vector<1x128xf32> to vector<16x128xf32>
      %24 = arith.addf %21, %23 : vector<16x128xf32>
      %c0_26 = arith.constant 0 : index
      %c0_27 = arith.constant 0 : index
      %25 = vector.load %arg8[%c0_26, %c0_27] : memref<16x128xf32, #tpu.memory_space<vmem>>, vector<16x128xf32>
      tpu.vector_store %arg8[%c0_26, %c0_27], %24 {strides = array<i32>} : memref<16x128xf32, #tpu.memory_space<vmem>>, vector<16x128xf32>,
    } else {
    }
    return
  }
  func.func @transform_0(%arg0: i32, %arg1: i32, %arg2: i32) -> (i32, i32) {
    %c0_i32 = arith.constant 0 : i32
    return %arg0, %arg2 : i32, i32
  }
  func.func @transform_1(%arg0: i32, %arg1: i32, %arg2: i32) -> (i32, i32) {
    %c0_i32 = arith.constant 0 : i32
    %c0_i32_0 = arith.constant 0 : i32
    return %arg2, %c0_i32 : i32, i32
  }
  func.func @transform_2(%arg0: i32, %arg1: i32, %arg2: i32) -> (i32, i32) {
    %c0_i32 = arith.constant 0 : i32
    %c0_i32_0 = arith.constant 0 : i32
    return %c0_i32, %arg1 : i32, i32
  }
  func.func @transform_3(%arg0: i32, %arg1: i32, %arg2: i32) -> (i32, i32) {
    %c0_i32 = arith.constant 0 : i32
    return %arg2, %arg1 : i32, i32
  }
  func.func @transform_4(%arg0: i32, %arg1: i32, %arg2: i32) -> (i32, i32) {
    %c0_i32 = arith.constant 0 : i32
    %c0_i32_0 = arith.constant 0 : i32
    return %c0_i32, %arg1 : i32, i32
  }
  func.func @transform_5(%arg0: i32, %arg1: i32, %arg2: i32) -> (i32, i32) {
    %c0_i32 = arith.constant 0 : i32
    return %arg0, %arg1 : i32, i32
  }
}

</mosaic_0001>

<bundles_post_ra>
// kernel: tpu_custom_call.1
= control target key start
LH: loop header
LB: loop body
LE: loop exit
PB: predicated region body
PF: predicated region fallthrough
CT: control target
= control target key end

     0   :  { %10 = vsyncpa [#allocation5], 0  ;;  %s759_s0 = inlined_call_operand.hbm [shape: f32[16,128], index: 0, kind: input, shape index: {}]   ;;  %s760_s1 = inlined_call_operand.hbm [shape: f32[128,128], index: 1, kind: input, shape index: {}]   ;;  %s761_s2 = inlined_call_operand.hbm [shape: f32[128,128], index: 2, kind: input, shape index: {}]   ;;  %s762_s3 = inlined_call_operand.hbm [shape: f32[128,128], index: 3, kind: input, shape index: {}]   ;;  %s763_s4 = inlined_call_operand.vmem [shape: f32[1,128], index: 4, kind: input, shape index: {}]   ;;  %s764_s5 = inlined_call_operand.hbm [shape: f32[16,128], index: 5, kind: output, shape index: {}]  }
   0x1   :  { %11 = vsyncpa [#allocation8], 0 }
   0x2   :  { %12 = vsyncpa [#allocation11], 0 }
   0x3   :  { %13 = vsyncpa [#allocation6], 0  ;;  %s685_s18 = smov [#allocation7]   ;;  %s686_s20 = smov [#allocation4]  }
   0x4   :  { %s31_s19 = sshll.u32 %s685_s18, 4  ;;  %s19_s21 = sshll.u32 %s686_s20, 4  ;;  %s32_s19 = int_to_ptr.vmem [resolvable:$true] %s31_s19  ;;  %s20_s21 = int_to_ptr.vmem [resolvable:$true] %s19_s21 }
   0x5   :  { %s585_s22 = scalar_lea.vmem %s32_s19, 2048  ;;  %p590_p1 = scmp.lt.s32.totalorder %s32_s19, %s32_s19 }
   0x6   :  { %p586_p0 = scmp.ne.s32.totalorder %s32_s19, %s585_s22  ;;  %p591_p2 = scmp.lt.s32.totalorder %s585_s22, %s585_s22 }
   0x8   :  { %p592_p3 = por %p591_p2, %p590_p1 }
   0xa   :  { %p593_p4 = pnand %p592_p3, %p586_p0 }
   0xc   :  { %596 = shalt.err (!%p593_p4)
}
   0xd   :  { %s687_s23 = smov 128   ;;  %s688_s24 = smov 8  }
   0xe   :  { %37 = dma.hbm_to_vmem [thread:$0]  %s760_s1, 2048, %s32_s19, [#allocation8], %s687_s23, %s687_s23, %s688_s24  }
   0xf   :  { %s605_s27 = scalar_lea.vmem %s20_s21, 256  ;;  %p610_p6 = scmp.lt.s32.totalorder %s20_s21, %s20_s21 }
  0x10   :  { %p606_p5 = scmp.ne.s32.totalorder %s20_s21, %s605_s27  ;;  %p611_p7 = scmp.lt.s32.totalorder %s605_s27, %s605_s27 }
  0x12   :  { %p612_p8 = por %p611_p7, %p610_p6 }
  0x14   :  { %p613_p9 = pnand %p612_p8, %p606_p5 }
  0x16   :  { %616 = shalt.err (!%p613_p9)
}
  0x17   :  { %25 = dma.hbm_to_vmem [thread:$0]  %s759_s0, 256, %s20_s21, [#allocation5], %s687_s23, %s687_s23, %s688_s24  }
  0x18   :  { %s689_s30 = smov [#allocation9]   ;;  %s690_s7 = smov [#allocation10]  }
  0x19   :  { %s43_s6 = sshll.u32 %s689_s30, 4  ;;  %s55_s8 = sshll.u32 %s690_s7, 4  ;;  %s44_s6 = int_to_ptr.vmem [resolvable:$true] %s43_s6  ;;  %s56_s8 = int_to_ptr.vmem [resolvable:$true] %s55_s8 }
  0x1a   :  { %s625_s1 = scalar_lea.vmem %s44_s6, 2048  ;;  %p630_p11 = scmp.lt.s32.totalorder %s44_s6, %s44_s6 }
  0x1b   :  { %p626_p10 = scmp.ne.s32.totalorder %s44_s6, %s625_s1  ;;  %p631_p12 = scmp.lt.s32.totalorder %s625_s1, %s625_s1 }
  0x1d   :  { %p632_p13 = por %p631_p12, %p630_p11 }
  0x1f   :  { %p633_p0 = pnand %p632_p13, %p626_p10 }
  0x21   :  { %636 = shalt.err (!%p633_p0)
}
  0x22   :  { %49 = dma.hbm_to_vmem [thread:$0]  %s761_s2, 2048, %s44_s6, [#allocation8], %s687_s23, %s687_s23, %s688_s24  }
  0x23   :  { %s645_s0 = scalar_lea.vmem %s56_s8, 2048  ;;  %p650_p2 = scmp.lt.s32.totalorder %s56_s8, %s56_s8 }
  0x24   :  { %p646_p1 = scmp.ne.s32.totalorder %s56_s8, %s645_s0  ;;  %p651_p3 = scmp.lt.s32.totalorder %s645_s0, %s645_s0 }
  0x26   :  { %p652_p4 = por %p651_p3, %p650_p2 }
  0x28   :  { %p653_p5 = pnand %p652_p4, %p646_p1 }
  0x2a   :  { %656 = shalt.err (!%p653_p5)
}
  0x2b   :  { %61 = dma.hbm_to_vmem [thread:$0]  %s762_s3, 2048, %s56_s8, [#allocation11], %s687_s23, %s687_s23, %s688_s24  }
  0x2c   :  { %677 = dma.done.wait [#allocation5], 256  }
  0x2d   :  { %678 = vsyncadd [#allocation5], 4294967040 }
  0x2e   :  { %679 = dma.done.wait [#allocation8], 4096  }
  0x2f   :  { %680 = vsyncadd [#allocation8], 4294963200 }
  0x30   :  { %681 = dma.done.wait [#allocation11], 2048  }
  0x31   :  { %682 = vsyncadd [#allocation11], 4294965248  ;;  %v200_v0 = vld [vmem:[#allocation7 + $0x78] sm:$0xff]  ;;  %v199_v1 = vld [vmem:[#allocation7 + $0x70] sm:$0xff]  ;;  %s691_s13 = smov [#allocation12]  }
  0x32   :  { %500 = vmatprep.subr.mxu1 %v200_v0  ;;  %v198_v2 = vld [vmem:[#allocation7 + $0x68] sm:$0xff]  ;;  %v197_v3 = vld [vmem:[#allocation7 + $0x60] sm:$0xff]  ;;  %v746_v4 = vld [vmem:[#allocation4] sm:$0xff]  ;;  %s396_s14 = sshll.u32 %s691_s13, 4  ;;  %s397_s14 = int_to_ptr.vmem [resolvable:$true] %s396_s14 }
  0x33   :  { %501 = vmatpush3.msra.mxu1 %v200_v0  ;;  %v196_v5 = vld [vmem:[#allocation7 + $0x58] sm:$0xff]  ;;  %532 = vmatprep.mubr.f32.mxu1 %v746_v4  ;;  %v102_v7 = vld [vmem:[#allocation10 + $0x70] sm:$0xff]  ;;  %v101_v9 = vld [vmem:[#allocation10 + $0x68] sm:$0xff]  ;;  %s657_s15 = scalar_lea.vmem %s397_s14, 256  ;;  %p662_p7 = scmp.lt.s32.totalorder %s397_s14, %s397_s14 }
  0x34   :  { %502 = vmatprep.subr.mxu1 %v199_v1  ;;  %v103_v6 = vld [vmem:[#allocation10 + $0x78] sm:$0xff]  ;;  %v195_v8 = vld [vmem:[#allocation7 + $0x50] sm:$0xff]  ;;  %v194_v10 = vld [vmem:[#allocation7 + $0x48] sm:$0xff]  ;;  %497 = vmatprep.mubr.f32.mxu0 %v746_v4  ;;  %p658_p6 = scmp.ne.s32.totalorder %s397_s14, %s657_s15  ;;  %p663_p8 = scmp.lt.s32.totalorder %s657_s15, %s657_s15 }
  0x35   :  { %503 = vmatpush3.msra.mxu1 %v199_v1  ;;  %465 = vmatprep.subr.mxu0 %v103_v6  ;;  %v100_v11 = vld [vmem:[#allocation10 + $0x60] sm:$0xff]  ;;  %v99_v13 = vld [vmem:[#allocation10 + $0x58] sm:$0xff]  ;;  %v98_v15 = vld [vmem:[#allocation10 + $0x50] sm:$0xff] }
  0x36   :  { %504 = vmatprep.subr.mxu1 %v198_v2  ;;  %466 = vmatpush3.msra.mxu0 %v103_v6  ;;  %v193_v12 = vld [vmem:[#allocation7 + $0x40] sm:$0xff]  ;;  %v192_v14 = vld [vmem:[#allocation7 + $0x38] sm:$0xff]  ;;  %v191_v16 = vld [vmem:[#allocation7 + $0x30] sm:$0xff]  ;;  %p664_p9 = por %p663_p8, %p662_p7 }
  0x37   :  { %505 = vmatpush3.msra.mxu1 %v198_v2  ;;  %467 = vmatprep.subr.mxu0 %v102_v7  ;;  %v97_v17 = vld [vmem:[#allocation10 + $0x48] sm:$0xff]  ;;  %v96_v19 = vld [vmem:[#allocation10 + $0x40] sm:$0xff]  ;;  %v95_v21 = vld [vmem:[#allocation10 + $0x38] sm:$0xff] }
  0x38   :  { %506 = vmatprep.subr.mxu1 %v197_v3  ;;  %468 = vmatpush3.msra.mxu0 %v102_v7  ;;  %v190_v18 = vld [vmem:[#allocation7 + $0x28] sm:$0xff]  ;;  %v189_v20 = vld [vmem:[#allocation7 + $0x20] sm:$0xff]  ;;  %v188_v22 = vld [vmem:[#allocation7 + $0x18] sm:$0xff]  ;;  %p665_p10 = pnand %p664_p9, %p658_p6 }
  0x39   :  { %507 = vmatpush3.msra.mxu1 %v197_v3  ;;  %469 = vmatprep.subr.mxu0 %v101_v9  ;;  %v94_v23 = vld [vmem:[#allocation10 + $0x30] sm:$0xff]  ;;  %v93_v25 = vld [vmem:[#allocation10 + $0x28] sm:$0xff]  ;;  %v92_v27 = vld [vmem:[#allocation10 + $0x20] sm:$0xff] }
  0x3a   :  { %508 = vmatprep.subr.mxu1 %v196_v5  ;;  %470 = vmatpush3.msra.mxu0 %v101_v9  ;;  %v187_v24 = vld [vmem:[#allocation7 + $0x10] sm:$0xff]  ;;  %v186_v26 = vld [vmem:[#allocation7 + $0x8] sm:$0xff]  ;;  %v185_v28 = vld [vmem:[#allocation7] sm:$0xff] }
  0x3b   :  { %509 = vmatpush3.msra.mxu1 %v196_v5  ;;  %471 = vmatprep.subr.mxu0 %v100_v11  ;;  %v91_v29 = vld [vmem:[#allocation10 + $0x18] sm:$0xff]  ;;  %v90_v31 = vld [vmem:[#allocation10 + $0x10] sm:$0xff]  ;;  %v89_v32 = vld [vmem:[#allocation10 + $0x8] sm:$0xff] }
  0x3c   :  { %510 = vmatprep.subr.mxu1 %v195_v8  ;;  %472 = vmatpush3.msra.mxu0 %v100_v11  ;;  %v85_v30 = vld [vmem:[#allocation4 + $0x8] sm:$0xff]  ;;  %v88_v33 = vld [vmem:[#allocation10] sm:$0xff]  ;;  %v301_v35 = vld [vmem:[#allocation9 + $0x70] sm:$0xff] }
  0x3d   :  { %511 = vmatpush3.msra.mxu1 %v195_v8  ;;  %473 = vmatprep.subr.mxu0 %v99_v13  ;;  %v302_v34 = vld [vmem:[#allocation9 + $0x78] sm:$0xff]  ;;  %v300_v36 = vld [vmem:[#allocation9 + $0x68] sm:$0xff]  ;;  %v299_v37 = vld [vmem:[#allocation9 + $0x60] sm:$0xff] }
  0x3e   :  { %512 = vmatprep.subr.mxu1 %v194_v10  ;;  %474 = vmatpush3.msra.mxu0 %v99_v13  ;;  %v298_v38 = vld [vmem:[#allocation9 + $0x58] sm:$0xff]  ;;  %v297_v39 = vld [vmem:[#allocation9 + $0x50] sm:$0xff]  ;;  %v296_v40 = vld [vmem:[#allocation9 + $0x48] sm:$0xff] }
  0x3f   :  { %513 = vmatpush3.msra.mxu1 %v194_v10  ;;  %475 = vmatprep.subr.mxu0 %v98_v15  ;;  %v295_v41 = vld [vmem:[#allocation9 + $0x40] sm:$0xff]  ;;  %v294_v42 = vld [vmem:[#allocation9 + $0x38] sm:$0xff]  ;;  %v293_v43 = vld [vmem:[#allocation9 + $0x30] sm:$0xff] }
  0x40   :  { %514 = vmatprep.subr.mxu1 %v193_v12  ;;  %476 = vmatpush3.msra.mxu0 %v98_v15  ;;  %v292_v44 = vld [vmem:[#allocation9 + $0x28] sm:$0xff]  ;;  %v291_v45 = vld [vmem:[#allocation9 + $0x20] sm:$0xff]  ;;  %v290_v46 = vld [vmem:[#allocation9 + $0x18] sm:$0xff] }
  0x41   :  { %515 = vmatpush3.msra.mxu1 %v193_v12  ;;  %477 = vmatprep.subr.mxu0 %v97_v17  ;;  %v289_v47 = vld [vmem:[#allocation9 + $0x10] sm:$0xff]  ;;  %v288_v48 = vld [vmem:[#allocation9 + $0x8] sm:$0xff]  ;;  %v287_v49 = vld [vmem:[#allocation9] sm:$0xff] }
  0x42   :  { %516 = vmatprep.subr.mxu1 %v192_v14  ;;  %478 = vmatpush3.msra.mxu0 %v97_v17  ;;  %v410_v55 = vld [vmem:[%s763_s4] ss:$0 sm:$0xff] }
  0x43   :  { %517 = vmatpush3.msra.mxu1 %v192_v14  ;;  %479 = vmatprep.subr.mxu0 %v96_v19 }
  0x44   :  { %518 = vmatprep.subr.mxu1 %v191_v16  ;;  %480 = vmatpush3.msra.mxu0 %v96_v19 }
  0x45   :  { %519 = vmatpush3.msra.mxu1 %v191_v16  ;;  %481 = vmatprep.subr.mxu0 %v95_v21 }
  0x46   :  { %520 = vmatprep.subr.mxu1 %v190_v18  ;;  %482 = vmatpush3.msra.mxu0 %v95_v21 }
  0x47   :  { %521 = vmatpush3.msra.mxu1 %v190_v18  ;;  %483 = vmatprep.subr.mxu0 %v94_v23 }
  0x48   :  { %522 = vmatprep.subr.mxu1 %v189_v20  ;;  %484 = vmatpush3.msra.mxu0 %v94_v23 }
  0x49   :  { %523 = vmatpush3.msra.mxu1 %v189_v20  ;;  %485 = vmatprep.subr.mxu0 %v93_v25 }
  0x4a   :  { %524 = vmatprep.subr.mxu1 %v188_v22  ;;  %486 = vmatpush3.msra.mxu0 %v93_v25 }
  0x4b   :  { %525 = vmatpush3.msra.mxu1 %v188_v22  ;;  %487 = vmatprep.subr.mxu0 %v92_v27 }
  0x4c   :  { %526 = vmatprep.subr.mxu1 %v187_v24  ;;  %488 = vmatpush3.msra.mxu0 %v92_v27 }
  0x4d   :  { %527 = vmatpush3.msra.mxu1 %v187_v24  ;;  %489 = vmatprep.subr.mxu0 %v91_v29 }
  0x4e   :  { %528 = vmatprep.subr.mxu1 %v186_v26  ;;  %490 = vmatpush3.msra.mxu0 %v91_v29 }
  0x4f   :  { %529 = vmatpush3.msra.mxu1 %v186_v26  ;;  %491 = vmatprep.subr.mxu0 %v90_v31 }
  0x50   :  { %530 = vmatprep.subr.mxu1 %v185_v28  ;;  %492 = vmatpush3.msra.mxu0 %v90_v31 }
  0x51   :  { %531 = vmatpush3.msra.mxu1 %v185_v28  ;;  %493 = vmatprep.subr.mxu0 %v89_v32 }
  0x52   :  { %533 = vmatmul.mubr.f32.vlgmr.msra.gmra.mxu1 %v85_v30  ;;  %494 = vmatpush3.msra.mxu0 %v89_v32 }
  0x53   :  { %495 = vmatprep.subr.mxu0 %v88_v33 }
  0x54   :  { %496 = vmatpush3.msra.mxu0 %v88_v33 }
  0x55   :  { %498 = vmatmul.mubr.f32.vlgmr.msra.gmra.mxu0 %v85_v30  ;;  %535 = vmatprep.subr.mxu0 %v302_v34 }
  0x56   :  { %536 = vmatpush3.msra.mxu0 %v302_v34 }
  0x57   :  { %537 = vmatprep.subr.mxu0 %v301_v35 }
  0x58   :  { %538 = vmatpush3.msra.mxu0 %v301_v35 }
  0x59   :  { %539 = vmatprep.subr.mxu0 %v300_v36 }
  0x5a   :  { %540 = vmatpush3.msra.mxu0 %v300_v36 }
  0x5b   :  { %541 = vmatprep.subr.mxu0 %v299_v37 }
  0x5c   :  { %542 = vmatpush3.msra.mxu0 %v299_v37 }
  0x5d   :  { %543 = vmatprep.subr.mxu0 %v298_v38 }
  0x5e   :  { %544 = vmatpush3.msra.mxu0 %v298_v38 }
  0x5f   :  { %545 = vmatprep.subr.mxu0 %v297_v39 }
  0x60   :  { %546 = vmatpush3.msra.mxu0 %v297_v39 }
  0x61   :  { %547 = vmatprep.subr.mxu0 %v296_v40 }
  0x62   :  { %548 = vmatpush3.msra.mxu0 %v296_v40 }
  0x63   :  { %549 = vmatprep.subr.mxu0 %v295_v41 }
  0x64   :  { %550 = vmatpush3.msra.mxu0 %v295_v41 }
  0x65   :  { %551 = vmatprep.subr.mxu0 %v294_v42 }
  0x66   :  { %552 = vmatpush3.msra.mxu0 %v294_v42 }
  0x67   :  { %553 = vmatprep.subr.mxu0 %v293_v43 }
  0x68   :  { %554 = vmatpush3.msra.mxu0 %v293_v43 }
  0x69   :  { %555 = vmatprep.subr.mxu0 %v292_v44 }
  0x6a   :  { %556 = vmatpush3.msra.mxu0 %v292_v44 }
  0x6b   :  { %557 = vmatprep.subr.mxu0 %v291_v45 }
  0x6c   :  { %558 = vmatpush3.msra.mxu0 %v291_v45 }
  0x6d   :  { %559 = vmatprep.subr.mxu0 %v290_v46 }
  0x6e   :  { %560 = vmatpush3.msra.mxu0 %v290_v46 }
  0x6f   :  { %561 = vmatprep.subr.mxu0 %v289_v47 }
  0x70   :  { %562 = vmatpush3.msra.mxu0 %v289_v47 }
  0x71   :  { %563 = vmatprep.subr.mxu0 %v288_v48 }
  0x72   :  { %564 = vmatpush3.msra.mxu0 %v288_v48 }
  0x73   :  { %565 = vmatprep.subr.mxu0 %v287_v49 }
  0x74   :  { %566 = vmatpush3.msra.mxu0 %v287_v49 }
 0x112   :  { %v534_v50 = vpop.f32.mrf.mxu1 }
 0x114   :  { %v267_v51 = vpop.f32.mrf.mxu1 }
 0x115   :  { %567 = vmatprep.mubr.f32.mxu0 %v267_v51  ;;  %v499_v52 = vpop.f32.mrf.mxu0 }
 0x116   :  { %568 = vmatmul.mubr.f32.vlgmr.msra.gmra.mxu0 %v534_v50 }
 0x117   :  { %v170_v53 = vpop.f32.mrf.mxu0 }
 0x1d6   :  { %v569_v54 = vpop.f32.mrf.mxu0 }
 0x1d7   :  { %v379_v56 = vadd.f32 %v569_v54, %v499_v52 }
 0x1d8   :  { %v369_v57 = vpop.f32.mrf.mxu0 }
 0x1d9   :  { %v388_v58 = vadd.f32 %v410_v55, %v379_v56  ;;  %v378_v59 = vadd.f32 %v369_v57, %v170_v53 }
 0x1db   :  { %390 = vst [vmem:[#allocation12 + $0x8] sm:$0xff] %v388_v58  ;;  %v387_v60 = vadd.f32 %v410_v55, %v378_v59 }
 0x1dd   :  { %389 = vst [vmem:[#allocation12] sm:$0xff] %v387_v60 }
 0x1de   :  { %668 = shalt.err (!%p665_p10)
}
 0x1df   :  { %402 = dma.vmem_to_hbm [thread:$0]  %s397_s14, 256, %s764_s5, [#allocation6], %s687_s23, %s687_s23, %s688_s24  }
 0x1e0   :  { %683 = dma.done.wait [#allocation6], 256  }
 0x1e1   :  { %684 = vsyncadd [#allocation6], 4294967040 }
 0x1e2   :  { %406 = vsyncpa [#allocation5], 1 }
 0x1e3   :  { %407 = vsyncpa [#allocation8], 1 }
 0x1e4   :  { %408 = vsyncpa [#allocation11], 1 }
 0x1e5   :  { %409 = vsyncpa [#allocation6], 1 }

</bundles_post_ra>
